<compile_context>
chip_gen: v7x
topology: tpu7x:2x2x1
jax: 0.10.0
libtpu: 0.0.40
codegen_flags: <defaults>
</compile_context>

<pallas_src>
import functools

import jax
import jax.numpy as jnp
from jax import lax
from jax.experimental import pallas as pl
from jax.experimental.pallas import tpu as pltpu

EPS = 1e-5
H1, H2 = 256, 128


def _round_up(n, m):
    return ((n + m - 1) // m) * m


def actor_kernel(x_ref, w1_ref, p1_ref, w2_ref, p2_ref, w3_ref, b3_ref, o_ref):
    # ---- Linear(S, 256) on the MXU (bf16 operands, f32 accumulate) ----
    h = jnp.dot(x_ref[...].astype(jnp.bfloat16), w1_ref[...],
                preferred_element_type=jnp.float32)
    p1 = p1_ref[...]                      # [3, 256]: rows = (bias, gamma, beta)
    h = jnp.maximum(h + p1[0:1, :], 0.0)

    # ---- BatchNorm1d(256): one cross-sublane reduce for both stats ----
    stats = jnp.mean(jnp.concatenate([h, h * h], axis=1), axis=0, keepdims=True)
    mu, ex2 = stats[:, :H1], stats[:, H1:]
    var = jnp.maximum(ex2 - mu * mu, 0.0)            # biased var, guard cancellation
    scale = p1[1:2, :] * lax.rsqrt(var + EPS)
    shift = p1[2:3, :] - mu * scale
    h = h * scale + shift

    # ---- Linear(256, 128) ----
    h = jnp.dot(h.astype(jnp.bfloat16), w2_ref[...],
                preferred_element_type=jnp.float32)
    p2 = p2_ref[...]                      # [3, 128]
    h = jnp.maximum(h + p2[0:1, :], 0.0)

    # ---- BatchNorm1d(128): one cross-sublane reduce for both stats ----
    stats = jnp.mean(jnp.concatenate([h, h * h], axis=1), axis=0, keepdims=True)
    mu, ex2 = stats[:, :H2], stats[:, H2:]
    var = jnp.maximum(ex2 - mu * mu, 0.0)
    scale = p2[1:2, :] * lax.rsqrt(var + EPS)
    shift = p2[2:3, :] - mu * scale
    h = h * scale + shift

    # ---- Linear(128, A_pad) + Tanh (lane-dense padded output block) ----
    y = jnp.dot(h.astype(jnp.bfloat16), w3_ref[...],
                preferred_element_type=jnp.float32) + b3_ref[...]
    o_ref[...] = jnp.tanh(y).astype(o_ref.dtype)


def prepare_params(params):
    """One-time, x-independent packing/padding/casting of the parameters.

    Call once; reuse the result across every actor_forward call so no
    concat/pad/convert ops run on the per-call path.
    """
    A = params["w3"].shape[1]
    A_pad = _round_up(max(A, 128), 128)

    # Pack per-feature vectors: one [3, H] operand per BN block (2 DMAs vs 6).
    p1 = jnp.concatenate([params["b1"], params["g1"], params["be1"]], axis=0)
    p2 = jnp.concatenate([params["b2"], params["g2"], params["be2"]], axis=0)

    # bf16 weights for the MXU; final layer zero-padded to a lane-dense width.
    w1 = params["w1"].astype(jnp.bfloat16)
    w2 = params["w2"].astype(jnp.bfloat16)
    w3 = jnp.zeros((H2, A_pad), jnp.bfloat16).at[:, :A].set(
        params["w3"].astype(jnp.bfloat16))
    b3 = jnp.zeros((1, A_pad), jnp.float32).at[:, :A].set(params["b3"])

    prepped = {"w1": w1, "p1": p1, "w2": w2, "p2": p2, "w3": w3, "b3": b3}
    # Materialize once on device so later calls just pass handles through.
    return jax.tree_util.tree_map(jax.block_until_ready,
                                  jax.device_put(prepped)), A


@functools.partial(jax.jit, static_argnames="action_dim")
def actor_forward(x, prepped, action_dim):
    """x: [B, state_dim] f32. prepped: output of prepare_params (arrays only)."""
    B = x.shape[0]
    A_pad = prepped["w3"].shape[1]

    vmem = pl.BlockSpec(memory_space=pltpu.MemorySpace.VMEM)
    out = pl.pallas_call(
        actor_kernel,
        out_shape=jax.ShapeDtypeStruct((B, A_pad), jnp.float32),
        in_specs=[vmem] * 7,
        out_specs=vmem,
    )(x, prepped["w1"], prepped["p1"], prepped["w2"], prepped["p2"],
      prepped["w3"], prepped["b3"])
    # In-kernel store is already lane-dense; this slice is the only copy left.
    # Callers that can carry the padded width may consume `out` directly.
    return out[:, :action_dim]


def _trunc_normal(key, shape, std):
    # matches spirit of nn.init.trunc_normal_(mean=0, std=sqrt(2/in_features))
    return std * jax.random.truncated_normal(key, -2.0, 2.0, shape, jnp.float32)


def init_actor_params(key, state_dim, action_dim):
    k = jax.random.split(key, 6)

    def bias(key, fan_in, n):
        bound = 1.0 / jnp.sqrt(fan_in)
        return jax.random.uniform(key, (1, n), jnp.float32, -bound, bound)

    return {
        # weights stored as [in, out] (transposed vs. PyTorch's [out, in])
        "w1": _trunc_normal(k[0], (state_dim, H1), (2.0 / state_dim) ** 0.5),
        "b1": bias(k[1], state_dim, H1),
        "g1": jnp.ones((1, H1), jnp.float32),
        "be1": jnp.zeros((1, H1), jnp.float32),
        "w2": _trunc_normal(k[2], (H1, H2), (2.0 / H1) ** 0.5),
        "b2": bias(k[3], H1, H2),
        "g2": jnp.ones((1, H2), jnp.float32),
        "be2": jnp.zeros((1, H2), jnp.float32),
        "w3": _trunc_normal(k[4], (H2, action_dim), (2.0 / H2) ** 0.5),
        "b3": bias(k[5], H2, action_dim),
    }


def actor_forward_ref(x, params):
    """Pure f32 JAX reference (PyTorch training-mode semantics)."""
    def bn(h, g, b):
        mu = jnp.mean(h, axis=0, keepdims=True)
        var = jnp.mean((h - mu) ** 2, axis=0, keepdims=True)
        return (h - mu) / jnp.sqrt(var + EPS) * g + b

    h = jnp.maximum(x @ params["w1"] + params["b1"], 0.0)
    h = bn(h, params["g1"], params["be1"])
    h = jnp.maximum(h @ params["w2"] + params["b2"], 0.0)
    h = bn(h, params["g2"], params["be2"])
    return jnp.tanh(h @ params["w3"] + params["b3"])


if __name__ == "__main__":
    key = jax.random.PRNGKey(0)
    k_param, k_x = jax.random.split(key)

    batch, state_dim, action_dim = 8, 16, 8
    params = init_actor_params(k_param, state_dim, action_dim)
    x = jax.random.normal(k_x, (batch, state_dim), jnp.float32)

    # One-time packing/padding/casting; reused across all forward calls.
    prepped, A = prepare_params(params)

    out = actor_forward(x, prepped, action_dim=A)
    jax.block_until_ready(out)

    ref = actor_forward_ref(x, params)
    assert out.shape == (batch, action_dim)
    # bf16 MXU operands perturb the f32 result slightly; BN absorbs most of it.
    assert jnp.allclose(out, ref, atol=5e-2, rtol=5e-2), (
        "mismatch vs reference: max |diff| = %g" % float(jnp.max(jnp.abs(out - ref))))

    print("KERNEL_OK")
</pallas_src>

<mosaic_0001>
module attributes {stable_mosaic.version = 11 : i64} {
  func.func @actor_kernel(%arg0: memref<8x16xf32, #tpu.memory_space<vmem>>, %arg1: memref<16x256xbf16, #tpu.memory_space<vmem>>, %arg2: memref<3x256xf32, #tpu.memory_space<vmem>>, %arg3: memref<256x128xbf16, #tpu.memory_space<vmem>>, %arg4: memref<3x128xf32, #tpu.memory_space<vmem>>, %arg5: memref<128x128xbf16, #tpu.memory_space<vmem>>, %arg6: memref<1x128xf32, #tpu.memory_space<vmem>>, %arg7: memref<8x128xf32, #tpu.memory_space<vmem>>) attributes {dimension_semantics = [], scalar_prefetch = 0 : i64, scratch_operands = 0 : i64, tpu.core_type = #tpu.core_type<tc>} {
    %c0 = arith.constant 0 : index
    %c0_0 = arith.constant 0 : index
    %0 = vector.load %arg0[%c0, %c0_0] : memref<8x16xf32, #tpu.memory_space<vmem>>, vector<8x16xf32>
    %1 = arith.truncf %0 : vector<8x16xf32> to vector<8x16xbf16>
    %c0_1 = arith.constant 0 : index
    %c0_2 = arith.constant 0 : index
    %2 = vector.load %arg1[%c0_1, %c0_2] : memref<16x256xbf16, #tpu.memory_space<vmem>>, vector<16x256xbf16>
    %cst = arith.constant dense<0.000000e+00> : vector<8x256xf32>
    %3 = tpu.matmul %1, %2, %cst {dimension_numbers = #tpu.dot_dimension_numbers<[1], [0], [0], [1], [0, 0, 1, 1], [], []>} : vector<8x16xbf16>, vector<16x256xbf16>, vector<8x256xf32> -> vector<8x256xf32>
    %c0_3 = arith.constant 0 : index
    %c0_4 = arith.constant 0 : index
    %4 = vector.load %arg2[%c0_3, %c0_4] : memref<3x256xf32, #tpu.memory_space<vmem>>, vector<3x256xf32>
    %5 = vector.extract_strided_slice %4 {offsets = [0, 0], sizes = [1, 256], strides = [1, 1]} : vector<3x256xf32> to vector<1x256xf32>
    %6 = vector.broadcast %5 : vector<1x256xf32> to vector<8x256xf32>
    %7 = arith.addf %3, %6 : vector<8x256xf32>
    %cst_5 = arith.constant 0.000000e+00 : f32
    %8 = vector.broadcast %cst_5 : f32 to vector<8x256xf32>
    %9 = arith.maximumf %7, %8 : vector<8x256xf32>
    %10 = arith.mulf %9, %9 : vector<8x256xf32>
    %11 = tpu.concatenate %9, %10 in 1 : vector<8x256xf32>, vector<8x256xf32> -> vector<8x512xf32>
    %cst_6 = arith.constant dense<0.000000e+00> : vector<512xf32>
    %12 = vector.multi_reduction <add>, %11, %cst_6 [0] : vector<8x512xf32> to vector<512xf32>
    %13 = vector.shape_cast %12 : vector<512xf32> to vector<1x512xf32>
    %cst_7 = arith.constant 8.000000e+00 : f32
    %14 = vector.broadcast %cst_7 : f32 to vector<1x512xf32>
    %15 = arith.divf %13, %14 : vector<1x512xf32>
    %16 = vector.extract_strided_slice %15 {offsets = [0, 0], sizes = [1, 256], strides = [1, 1]} : vector<1x512xf32> to vector<1x256xf32>
    %17 = vector.extract_strided_slice %15 {offsets = [0, 256], sizes = [1, 256], strides = [1, 1]} : vector<1x512xf32> to vector<1x256xf32>
    %18 = arith.mulf %16, %16 : vector<1x256xf32>
    %19 = arith.subf %17, %18 : vector<1x256xf32>
    %cst_8 = arith.constant 0.000000e+00 : f32
    %20 = vector.broadcast %cst_8 : f32 to vector<1x256xf32>
    %21 = arith.maximumf %19, %20 : vector<1x256xf32>
    %22 = vector.extract_strided_slice %4 {offsets = [1, 0], sizes = [1, 256], strides = [1, 1]} : vector<3x256xf32> to vector<1x256xf32>
    %cst_9 = arith.constant 9.99999974E-6 : f32
    %23 = vector.broadcast %cst_9 : f32 to vector<1x256xf32>
    %24 = arith.addf %21, %23 : vector<1x256xf32>
    %25 = math.rsqrt %24 : vector<1x256xf32>
    %26 = arith.mulf %22, %25 : vector<1x256xf32>
    %27 = vector.extract_strided_slice %4 {offsets = [2, 0], sizes = [1, 256], strides = [1, 1]} : vector<3x256xf32> to vector<1x256xf32>
    %28 = arith.mulf %16, %26 : vector<1x256xf32>
    %29 = arith.subf %27, %28 : vector<1x256xf32>
    %30 = vector.broadcast %26 : vector<1x256xf32> to vector<8x256xf32>
    %31 = arith.mulf %9, %30 : vector<8x256xf32>
    %32 = vector.broadcast %29 : vector<1x256xf32> to vector<8x256xf32>
    %33 = arith.addf %31, %32 : vector<8x256xf32>
    %34 = arith.truncf %33 : vector<8x256xf32> to vector<8x256xbf16>
    %c0_10 = arith.constant 0 : index
    %c0_11 = arith.constant 0 : index
    %35 = vector.load %arg3[%c0_10, %c0_11] : memref<256x128xbf16, #tpu.memory_space<vmem>>, vector<256x128xbf16>
    %cst_12 = arith.constant dense<0.000000e+00> : vector<8x128xf32>
    %36 = tpu.matmul %34, %35, %cst_12 {dimension_numbers = #tpu.dot_dimension_numbers<[1], [0], [0], [1], [0, 0, 1, 1], [], []>} : vector<8x256xbf16>, vector<256x128xbf16>, vector<8x128xf32> -> vector<8x128xf32>
    %c0_13 = arith.constant 0 : index
    %c0_14 = arith.constant 0 : index
    %37 = vector.load %arg4[%c0_13, %c0_14] : memref<3x128xf32, #tpu.memory_space<vmem>>, vector<3x128xf32>
    %38 = vector.extract_strided_slice %37 {offsets = [0, 0], sizes = [1, 128], strides = [1, 1]} : vector<3x128xf32> to vector<1x128xf32>
    %39 = vector.broadcast %38 : vector<1x128xf32> to vector<8x128xf32>
    %40 = arith.addf %36, %39 : vector<8x128xf32>
    %cst_15 = arith.constant 0.000000e+00 : f32
    %41 = vector.broadcast %cst_15 : f32 to vector<8x128xf32>
    %42 = arith.maximumf %40, %41 : vector<8x128xf32>
    %43 = arith.mulf %42, %42 : vector<8x128xf32>
    %44 = tpu.concatenate %42, %43 in 1 : vector<8x128xf32>, vector<8x128xf32> -> vector<8x256xf32>
    %cst_16 = arith.constant dense<0.000000e+00> : vector<256xf32>
    %45 = vector.multi_reduction <add>, %44, %cst_16 [0] : vector<8x256xf32> to vector<256xf32>
    %46 = vector.shape_cast %45 : vector<256xf32> to vector<1x256xf32>
    %cst_17 = arith.constant 8.000000e+00 : f32
    %47 = vector.broadcast %cst_17 : f32 to vector<1x256xf32>
    %48 = arith.divf %46, %47 : vector<1x256xf32>
    %49 = vector.extract_strided_slice %48 {offsets = [0, 0], sizes = [1, 128], strides = [1, 1]} : vector<1x256xf32> to vector<1x128xf32>
    %50 = vector.extract_strided_slice %48 {offsets = [0, 128], sizes = [1, 128], strides = [1, 1]} : vector<1x256xf32> to vector<1x128xf32>
    %51 = arith.mulf %49, %49 : vector<1x128xf32>
    %52 = arith.subf %50, %51 : vector<1x128xf32>
    %cst_18 = arith.constant 0.000000e+00 : f32
    %53 = vector.broadcast %cst_18 : f32 to vector<1x128xf32>
    %54 = arith.maximumf %52, %53 : vector<1x128xf32>
    %55 = vector.extract_strided_slice %37 {offsets = [1, 0], sizes = [1, 128], strides = [1, 1]} : vector<3x128xf32> to vector<1x128xf32>
    %cst_19 = arith.constant 9.99999974E-6 : f32
    %56 = vector.broadcast %cst_19 : f32 to vector<1x128xf32>
    %57 = arith.addf %54, %56 : vector<1x128xf32>
    %58 = math.rsqrt %57 : vector<1x128xf32>
    %59 = arith.mulf %55, %58 : vector<1x128xf32>
    %60 = vector.extract_strided_slice %37 {offsets = [2, 0], sizes = [1, 128], strides = [1, 1]} : vector<3x128xf32> to vector<1x128xf32>
    %61 = arith.mulf %49, %59 : vector<1x128xf32>
    %62 = arith.subf %60, %61 : vector<1x128xf32>
    %63 = vector.broadcast %59 : vector<1x128xf32> to vector<8x128xf32>
    %64 = arith.mulf %42, %63 : vector<8x128xf32>
    %65 = vector.broadcast %62 : vector<1x128xf32> to vector<8x128xf32>
    %66 = arith.addf %64, %65 : vector<8x128xf32>
    %67 = arith.truncf %66 : vector<8x128xf32> to vector<8x128xbf16>
    %c0_20 = arith.constant 0 : index
    %c0_21 = arith.constant 0 : index
    %68 = vector.load %arg5[%c0_20, %c0_21] : memref<128x128xbf16, #tpu.memory_space<vmem>>, vector<128x128xbf16>
    %cst_22 = arith.constant dense<0.000000e+00> : vector<8x128xf32>
    %69 = tpu.matmul %67, %68, %cst_22 {dimension_numbers = #tpu.dot_dimension_numbers<[1], [0], [0], [1], [0, 0, 1, 1], [], []>} : vector<8x128xbf16>, vector<128x128xbf16>, vector<8x128xf32> -> vector<8x128xf32>
    %c0_23 = arith.constant 0 : index
    %c0_24 = arith.constant 0 : index
    %70 = vector.load %arg6[%c0_23, %c0_24] : memref<1x128xf32, #tpu.memory_space<vmem>>, vector<1x128xf32>
    %71 = vector.broadcast %70 : vector<1x128xf32> to vector<8x128xf32>
    %72 = arith.addf %69, %71 : vector<8x128xf32>
    %73 = math.tanh %72 : vector<8x128xf32>
    %c0_25 = arith.constant 0 : index
    %c0_26 = arith.constant 0 : index
    %74 = vector.load %arg7[%c0_25, %c0_26] : memref<8x128xf32, #tpu.memory_space<vmem>>, vector<8x128xf32>
    tpu.vector_store %arg7[%c0_25, %c0_26], %73 {strides = array<i32>} : memref<8x128xf32, #tpu.memory_space<vmem>>, vector<8x128xf32>,
    return
  }
}

</mosaic_0001>

<bundles_post_ra>
// kernel: actor_forward.1
= control target key start
LH: loop header
LB: loop body
LE: loop exit
PB: predicated region body
PF: predicated region fallthrough
CT: control target
= control target key end

     0   :  { %12 = vsyncpa [#allocation3], 0  ;;  %s1049_s0 = inlined_call_operand.hbm [shape: f32[8,16], index: 0, kind: input, shape index: {}]   ;;  %s1050_s1 = inlined_call_operand.hbm [shape: bf16[16,256], index: 1, kind: input, shape index: {}]   ;;  %s1051_s2 = inlined_call_operand.hbm [shape: f32[3,256], index: 2, kind: input, shape index: {}]   ;;  %s1052_s3 = inlined_call_operand.hbm [shape: bf16[256,128], index: 3, kind: input, shape index: {}]   ;;  %s1053_s4 = inlined_call_operand.vmem [shape: f32[3,128], index: 4, kind: input, shape index: {}]   ;;  %s1054_s5 = inlined_call_operand.hbm [shape: bf16[128,128], index: 5, kind: input, shape index: {}]   ;;  %s1055_s6 = inlined_call_operand.vmem [shape: f32[1,128], index: 6, kind: input, shape index: {}]   ;;  %s1056_s7 = inlined_call_operand.hbm [shape: f32[8,128], index: 7, kind: output, shape index: {}]  }
   0x1   :  { %13 = vsyncpa [#allocation6], 0 }
   0x2   :  { %14 = vsyncpa [#allocation9], 0 }
   0x3   :  { %15 = vsyncpa [#allocation4], 0  ;;  %s880_s24 = smov [#allocation5]   ;;  %s740_s28 = scalar_lea.hbm %s1050_s1, 256 }
   0x4   :  { %s31_s25 = sshll.u32 %s880_s24, 4  ;;  %p741_p0 = scmp.ne.s32.totalorder %s1050_s1, %s740_s28  ;;  %s32_s25 = int_to_ptr.vmem [resolvable:$true] %s31_s25 }
   0x5   :  { %p744_p1 = scmp.lt.u32.totalorder %s740_s28, %s1050_s1 }
   0x7   :  { %p746_p2 = pnand %p744_p1, %p741_p0 }
   0x9   :  { %749 = shalt.err (!%p746_p2)
}
   0xa   :  { %s750_s10 = scalar_lea.vmem %s32_s25, 256  ;;  %p755_p4 = scmp.lt.s32.totalorder %s32_s25, %s32_s25 }
   0xb   :  { %p751_p3 = scmp.ne.s32.totalorder %s32_s25, %s750_s10  ;;  %p756_p5 = scmp.lt.s32.totalorder %s750_s10, %s750_s10 }
   0xd   :  { %p757_p6 = por %p756_p5, %p755_p4 }
   0xf   :  { %p758_p7 = pnand %p757_p6, %p751_p3 }
  0x11   :  { %761 = shalt.err (!%p758_p7)
}
  0x12   :  { %s881_s11 = smov 128   ;;  %s882_s12 = smov 8  }
  0x13   :  { %37 = dma.hbm_to_vmem [thread:$0]  %s1050_s1, 256, %s32_s25, [#allocation6], %s881_s11, %s881_s11, %s882_s12  }
  0x14   :  { %s883_s15 = smov [#allocation8]   ;;  %s762_s19 = scalar_lea.hbm %s1052_s3, 2048 }
  0x15   :  { %s53_s16 = sshll.u32 %s883_s15, 4  ;;  %p763_p8 = scmp.ne.s32.totalorder %s1052_s3, %s762_s19  ;;  %s54_s16 = int_to_ptr.vmem [resolvable:$true] %s53_s16 }
  0x16   :  { %p766_p9 = scmp.lt.u32.totalorder %s762_s19, %s1052_s3 }
  0x18   :  { %p768_p10 = pnand %p766_p9, %p763_p8 }
  0x1a   :  { %771 = shalt.err (!%p768_p10)
}
  0x1b   :  { %s772_s24 = scalar_lea.vmem %s54_s16, 2048  ;;  %p777_p12 = scmp.lt.s32.totalorder %s54_s16, %s54_s16 }
  0x1c   :  { %p773_p11 = scmp.ne.s32.totalorder %s54_s16, %s772_s24  ;;  %p778_p13 = scmp.lt.s32.totalorder %s772_s24, %s772_s24 }
  0x1e   :  { %p779_p0 = por %p778_p13, %p777_p12 }
  0x20   :  { %p780_p1 = pnand %p779_p0, %p773_p11 }
  0x22   :  { %783 = shalt.err (!%p780_p1)
}
  0x23   :  { %s884_s1 = smov 64   ;;  %s885_s25 = smov 4  }
  0x24   :  { %59 = dma.hbm_to_vmem [thread:$0]  %s1052_s3, 2048, %s54_s16, [#allocation9], %s884_s1, %s884_s1, %s885_s25  }
  0x25   :  { %s886_s28 = smov [#allocation2]   ;;  %s887_s30 = smov [#allocation7]  }
  0x26   :  { %s22_s29 = sshll.u32 %s886_s28, 4  ;;  %s44_s8 = sshll.u32 %s887_s30, 4  ;;  %s23_s29 = int_to_ptr.vmem [resolvable:$true] %s22_s29  ;;  %s45_s8 = int_to_ptr.vmem [resolvable:$true] %s44_s8 }
  0x27   :  { %s784_s11 = scalar_lea.hbm %s1049_s0, 128 }
  0x28   :  { %p785_p2 = scmp.ne.s32.totalorder %s1049_s0, %s784_s11  ;;  %p788_p3 = scmp.lt.u32.totalorder %s784_s11, %s1049_s0 }
  0x2a   :  { %p790_p4 = pnand %p788_p3, %p785_p2 }
  0x2c   :  { %793 = shalt.err (!%p790_p4)
}
  0x2d   :  { %s794_s3 = scalar_lea.vmem %s23_s29, 128  ;;  %p799_p6 = scmp.lt.s32.totalorder %s23_s29, %s23_s29 }
  0x2e   :  { %p795_p5 = scmp.ne.s32.totalorder %s23_s29, %s794_s3  ;;  %p800_p7 = scmp.lt.s32.totalorder %s794_s3, %s794_s3 }
  0x30   :  { %p801_p8 = por %p800_p7, %p799_p6 }
  0x32   :  { %p802_p9 = pnand %p801_p8, %p795_p5 }
  0x34   :  { %805 = shalt.err (!%p802_p9)
}
  0x35   :  { %25 = dma.hbm_to_vmem [thread:$0]  %s1049_s0, 128, %s23_s29, [#allocation3]  }
  0x36   :  { %s806_s20 = scalar_lea.hbm %s1051_s2, 128 }
  0x37   :  { %p807_p10 = scmp.ne.s32.totalorder %s1051_s2, %s806_s20  ;;  %p810_p11 = scmp.lt.u32.totalorder %s806_s20, %s1051_s2 }
  0x39   :  { %p812_p12 = pnand %p810_p11, %p807_p10 }
  0x3b   :  { %815 = shalt.err (!%p812_p12)
}
  0x3c   :  { %s816_s26 = scalar_lea.vmem %s45_s8, 128  ;;  %p821_p0 = scmp.lt.s32.totalorder %s45_s8, %s45_s8 }
  0x3d   :  { %p817_p13 = scmp.ne.s32.totalorder %s45_s8, %s816_s26  ;;  %p822_p1 = scmp.lt.s32.totalorder %s816_s26, %s816_s26 }
  0x3f   :  { %p823_p2 = por %p822_p1, %p821_p0 }
  0x41   :  { %p824_p3 = pnand %p823_p2, %p817_p13 }
  0x43   :  { %827 = shalt.err (!%p824_p3)
}
  0x44   :  { %47 = dma.hbm_to_vmem [thread:$0]  %s1051_s2, 128, %s45_s8, [#allocation6]  }
  0x45   :  { %s888_s28 = smov [#allocation10]   ;;  %s828_s10 = scalar_lea.hbm %s1054_s5, 1024 }
  0x46   :  { %s67_s29 = sshll.u32 %s888_s28, 4  ;;  %p829_p4 = scmp.ne.s32.totalorder %s1054_s5, %s828_s10  ;;  %s68_s29 = int_to_ptr.vmem [resolvable:$true] %s67_s29 }
  0x47   :  { %p832_p5 = scmp.lt.u32.totalorder %s828_s10, %s1054_s5 }
  0x49   :  { %p834_p6 = pnand %p832_p5, %p829_p4 }
  0x4b   :  { %837 = shalt.err (!%p834_p6)
}
  0x4c   :  { %s838_s15 = scalar_lea.vmem %s68_s29, 1024  ;;  %p843_p8 = scmp.lt.s32.totalorder %s68_s29, %s68_s29 }
  0x4d   :  { %p839_p7 = scmp.ne.s32.totalorder %s68_s29, %s838_s15  ;;  %p844_p9 = scmp.lt.s32.totalorder %s838_s15, %s838_s15 }
  0x4f   :  { %p845_p10 = por %p844_p9, %p843_p8 }
  0x51   :  { %p846_p11 = pnand %p845_p10, %p839_p7 }
  0x53   :  { %849 = shalt.err (!%p846_p11)
}
  0x54   :  { %73 = dma.hbm_to_vmem [thread:$0]  %s1054_s5, 1024, %s68_s29, [#allocation9], %s884_s1, %s884_s1, %s885_s25  }
  0x55   :  { %872 = dma.done.wait [#allocation3], 128  }
  0x56   :  { %873 = vsyncadd [#allocation3], 4294967168 }
  0x57   :  { %874 = dma.done.wait [#allocation6], 384  }
  0x58   :  { %875 = vsyncadd [#allocation6], 4294966912 }
  0x59   :  { %876 = dma.done.wait [#allocation9], 3072  }
  0x5a   :  { %877 = vsyncadd [#allocation9], 4294964224  ;;  %v889_v0 = vmov 0   ;;  %v705_v1 = vld [vmem:[#allocation5 + $0x4] ss:$8 sps:$4 sm:$0xff]   ;;  %v92_v3 = vld [vmem:[#allocation2] sm:$0xff]  ;;  %v98_v21 = vlaneseq }
  0x5b   :  { %162 = vmatprep.mubr.bf16.mxu0 %v889_v0  ;;  %v707_v2 = vld [vmem:[#allocation5] ss:$8 sps:$4 sm:$0xff]   ;;  %vm126_vm0 = vcmask 130048   ;;  %130 = vmatprep.subr.bf16.mxu0 %v705_v1  ;;  %v93_v4 = vpack.c.bf16 %v92_v3, %v92_v3  ;;  %v708_v5 = vld [vmem:[#allocation8 + $0x40] sm:$0xff]   ;;  %v714_v11 = vld [vmem:[#allocation8 + $0x58] sm:$0xff]   ;;  %vm891_vm1 = vmmov 0  }
  0x5c   :  { %131 = vmatpush1.bf16.msra.mxu0 %v707_v2  ;;  %v709_v6 = vld [vmem:[#allocation8] sm:$0xff]   ;;  %v710_v7 = vld [vmem:[#allocation8 + $0x48] sm:$0xff]   ;;  %641 = vmatprep.subr.bf16.mxu1 %v708_v5  ;;  %v712_v9 = vld [vmem:[#allocation8 + $0x50] sm:$0xff]   ;;  %v999_v22 = vshrl.u32 %v98_v21, 7  ;;  %s892_s3 = smov [#allocation11]  }
  0x5d   :  { %642 = vmatpush3.bf16.msra.mxu1 %v709_v6  ;;  %v711_v8 = vld [vmem:[#allocation8 + $0x8] sm:$0xff]   ;;  %v713_v10 = vld [vmem:[#allocation8 + $0x10] sm:$0xff]   ;;  %v715_v12 = vld [vmem:[#allocation8 + $0x18] sm:$0xff]   ;;  %s602_s16 = sshll.u32 %s892_s3, 4  ;;  %s603_s16 = int_to_ptr.vmem [resolvable:$true] %s602_s16 }
  0x5e   :  { %643 = vmatprep.subr.bf16.mxu1 %v710_v7  ;;  %v716_v13 = vld [vmem:[#allocation8 + $0x60] sm:$0xff]   ;;  %v718_v15 = vld [vmem:[#allocation8 + $0x68] sm:$0xff]   ;;  %v720_v17 = vld [vmem:[#allocation8 + $0x70] sm:$0xff]   ;;  %v1002_v23 = vsub.s32 0, %v999_v22  ;;  %v104_v25 = vsub.s32 4, %v999_v22  ;;  %s850_s17 = scalar_lea.vmem %s603_s16, 128  ;;  %p855_p13 = scmp.lt.s32.totalorder %s603_s16, %s603_s16 }
  0x5f   :  { %615 = vmatmul.mubr.msk.bf16.vlgmr.msra.gmra.mrb[0].mxu0 %vm126_vm0, %v93_v4  ;;  %v717_v14 = vld [vmem:[#allocation8 + $0x20] sm:$0xff]   ;;  %v719_v16 = vld [vmem:[#allocation8 + $0x28] sm:$0xff]   ;;  %v721_v18 = vld [vmem:[#allocation8 + $0x30] sm:$0xff]   ;;  %p851_p12 = scmp.ne.s32.totalorder %s603_s16, %s850_s17  ;;  %p856_p0 = scmp.lt.s32.totalorder %s850_s17, %s850_s17 }
  0x60   :  { %v722_v19 = vld [vmem:[#allocation8 + $0x78] sm:$0xff]  }
  0x61   :  { %644 = vmatpush3.bf16.msra.mxu1 %v711_v8  ;;  %v723_v20 = vld [vmem:[#allocation8 + $0x38] sm:$0xff]   ;;  %p857_p1 = por %p856_p0, %p855_p13 }
  0x62   :  { %645 = vmatprep.subr.bf16.mxu1 %v712_v9  ;;  %v1004_v24 = vld [vmem:[#allocation7] sm:$0x77] }
  0x63   :  { %v101_v26 = vrot.slane %v1004_v24, %v1002_v23  ;;  %v105_v27 = vrot.slane %v1004_v24, %v104_v25  ;;  %p858_p2 = pnand %p857_p1, %p851_p12 }
  0x65   :  { %646 = vmatpush3.bf16.msra.mxu1 %v713_v10  ;;  %v111_v28 = vrot.slane %v101_v26, %v1002_v23  ;;  %v115_v29 = vrot.slane %v105_v27, %v1002_v23 }
  0x66   :  { %647 = vmatprep.subr.bf16.mxu1 %v714_v11 }
  0x69   :  { %648 = vmatpush3.bf16.msra.mxu1 %v715_v12 }
  0x6a   :  { %649 = vmatprep.subr.bf16.mxu1 %v716_v13 }
  0x6d   :  { %650 = vmatpush3.bf16.msra.mxu1 %v717_v14 }
  0x6e   :  { %651 = vmatprep.subr.bf16.mxu1 %v718_v15 }
  0x71   :  { %652 = vmatpush3.bf16.msra.mxu1 %v719_v16  ;;  %v1013_v16 = vsub.s32 1, %v999_v22 }
  0x72   :  { %653 = vmatprep.subr.bf16.mxu1 %v720_v17  ;;  %v227_v17 = vsub.s32 5, %v999_v22 }
  0x75   :  { %654 = vmatpush3.bf16.msra.mxu1 %v721_v18 }
  0x76   :  { %655 = vmatprep.subr.bf16.mxu1 %v722_v19 }
  0x79   :  { %656 = vmatpush3.bf16.msra.mxu1 %v723_v20 }
 0x132   :  { %v164_v30 = vpop.f32.mrb[0].mxu0 }
 0x133   :  { %v165_v31 = vadd.f32 %v164_v30, %v111_v28  ;;  %v166_v32 = vpop.f32.mrb[1].mxu0 }
 0x134   :  { %v167_v33 = vadd.f32 %v166_v32, %v115_v29  ;;  %v168_v34 = vpop.f32.mrb[2].mxu0  ;;  %v1021_v32 = vsub.s32 2, %v999_v22 }
 0x135   :  { %v171_v35 = vmax.f32 %v165_v31, 0.0  ;;  %v169_v36 = vpop.f32.mrb[3].mxu0 }
 0x136   :  { %v172_v37 = vmax.f32 %v167_v33, 0.0  ;;  %v256_v33 = vsub.s32 6, %v999_v22  ;;  %v725_v22 = vld [vmem:[#allocation10 + $0x8] sm:$0xff]  }
 0x137   :  { %v173_v38 = vmul.f32 %v171_v35, %v171_v35  ;;  %v175_v39 = vrot.slane %v171_v35, 4 }
 0x138   :  { %v174_v40 = vmul.f32 %v172_v37, %v172_v37  ;;  %v181_v41 = vrot.slane %v172_v37, 4 }
 0x139   :  { %v176_v42 = vadd.f32 %v175_v39, %v171_v35  ;;  %v187_v43 = vrot.slane %v173_v38, 4 }
 0x13a   :  { %v182_v44 = vadd.f32 %v181_v41, %v172_v37  ;;  %v193_v45 = vrot.slane %v174_v40, 4 }
 0x13b   :  { %v177_v46 = vrot.slane %v176_v42, 2  ;;  %v188_v47 = vadd.f32 %v187_v43, %v173_v38 }
 0x13c   :  { %v183_v48 = vrot.slane %v182_v44, 2  ;;  %v194_v49 = vadd.f32 %v193_v45, %v174_v40  ;;  %v727_v45 = vld [vmem:[#allocation10 + $0x18] sm:$0xff]  }
 0x13d   :  { %v178_v50 = vadd.f32 %v177_v46, %v176_v42  ;;  %v189_v51 = vrot.slane %v188_v47, 2  ;;  %v728_v46 = vld [vmem:[#allocation10 + $0x20] sm:$0xff]  }
 0x13e   :  { %v184_v52 = vadd.f32 %v183_v48, %v182_v44  ;;  %v195_v53 = vrot.slane %v194_v49, 2  ;;  %v890_v44 = vmov 0.0   ;;  %v730_v48 = vld [vmem:[#allocation10 + $0x30] sm:$0xff]  }
 0x13f   :  { %v179_v54 = vrot.slane %v178_v50, 1  ;;  %v190_v55 = vadd.f32 %v189_v51, %v188_v47  ;;  %672 = vmatprep.subr.bf16.mxu0 %v890_v44  ;;  %v729_v47 = vld [vmem:[#allocation10 + $0x28] sm:$0xff]   ;;  %688 = vmatprep.mubr.msk.bf16.mxu0 %vm891_vm1, %v890_v44 }
 0x140   :  { %v196_v56 = vadd.f32 %v195_v53, %v194_v49  ;;  %v185_v57 = vrot.slane %v184_v52, 1  ;;  %v731_v49 = vld [vmem:[#allocation10 + $0x38] sm:$0xff]  }
 0x141   :  { %v180_v58 = vadd.f32 %v179_v54, %v178_v50  ;;  %v191_v59 = vrot.slane %v190_v55, 1  ;;  %v304_v50 = vld [vmem:[%s1053_s4] sm:$0x7] }
 0x142   :  { %v197_v60 = vrot.slane %v196_v56, 1  ;;  %v186_v61 = vadd.f32 %v185_v57, %v184_v52  ;;  %v308_v52 = vrot.slane %v304_v50, %v1002_v23 }
 0x143   :  { %v192_v62 = vadd.f32 %v191_v59, %v190_v55  ;;  %v200_v63 = vmul.f32 0.125, %v180_v58 }
 0x144   :  { %v198_v0 = vadd.f32 %v197_v60, %v196_v56  ;;  %v201_v1 = vmul.f32 0.125, %v186_v61 }
 0x145   :  { %v202_v2 = vmul.f32 0.125, %v192_v62  ;;  %v204_v3 = vmul.f32 %v200_v63, %v200_v63 }
 0x146   :  { %v203_v4 = vmul.f32 0.125, %v198_v0  ;;  %v205_v5 = vmul.f32 %v201_v1, %v201_v1 }
 0x147   :  { %v206_v6 = vsub.f32 %v202_v2, %v204_v3 }
 0x148   :  { %v207_v7 = vsub.f32 %v203_v4, %v205_v5 }
 0x149   :  { %v208_v8 = vmax.f32 %v206_v6, 0.0 }
 0x14a   :  { %v209_v9 = vmax.f32 %v207_v7, 0.0 }
 0x14b   :  { %v210_v10 = vadd.f32 1e-05, %v208_v8 }
 0x14c   :  { %v211_v11 = vadd.f32 1e-05, %v209_v9 }
 0x14d   :  { %732 = vrsqrt.f32 %v210_v10 }
 0x14e   :  { %734 = vrsqrt.f32 %v211_v11 }
 0x157   :  { %v733_v12 = vpop.eup %732 }
 0x158   :  { %v735_v13 = vpop.eup %734 }
 0x159   :  { %v216_v14 = vcombine.low %v733_v12, %v735_v13 }
 0x15b   :  { %v217_v15 = vrot.slane %v216_v14, 7 }
 0x15d   :  { %v219_v18 = vmul.f32 %v217_v15, %v1004_v24 }
 0x15f   :  { %v224_v19 = vrot.slane %v219_v18, %v1013_v16  ;;  %v228_v20 = vrot.slane %v219_v18, %v227_v17 }
 0x161   :  { %v231_v21 = vmul.f32 %v224_v19, %v200_v63  ;;  %v232_v25 = vmul.f32 %v228_v20, %v201_v1  ;;  %v246_v26 = vrot.slane %v228_v20, %v1013_v16  ;;  %v242_v27 = vrot.slane %v224_v19, %v1013_v16 }
 0x163   :  { %v235_v28 = vcombine.low %v231_v21, %v232_v25  ;;  %v248_v29 = vmul.f32 %v246_v26, %v172_v37  ;;  %v247_v30 = vmul.f32 %v242_v27, %v171_v35  ;;  %v724_v35 = vld [vmem:[#allocation10] sm:$0xff]  }
 0x164   :  { %673 = vmatpush3.bf16.msra.mxu0 %v724_v35  ;;  %v632_v27 = vld [vmem:[%s1055_s6] ss:$0 sm:$0xff] }
 0x165   :  { %v236_v31 = vrot.slane %v235_v28, 6  ;;  %674 = vmatprep.subr.bf16.mxu0 %v890_v44 }
 0x167   :  { %v238_v34 = vsub.f32 %v1004_v24, %v236_v31  ;;  %v726_v24 = vld [vmem:[#allocation10 + $0x10] sm:$0xff]  }
 0x168   :  { %675 = vmatpush3.bf16.msra.mxu0 %v725_v22 }
 0x169   :  { %v257_v36 = vrot.slane %v238_v34, %v256_v33  ;;  %v253_v38 = vrot.slane %v238_v34, %v1021_v32  ;;  %676 = vmatprep.subr.bf16.mxu0 %v890_v44 }
 0x16b   :  { %v267_v39 = vrot.slane %v257_v36, %v1021_v32  ;;  %v263_v40 = vrot.slane %v253_v38, %v1021_v32 }
 0x16c   :  { %677 = vmatpush3.bf16.msra.mxu0 %v726_v24 }
 0x16d   :  { %v269_v41 = vadd.f32 %v267_v39, %v248_v29  ;;  %v268_v42 = vadd.f32 %v263_v40, %v247_v30  ;;  %678 = vmatprep.subr.bf16.mxu0 %v890_v44 }
 0x16f   :  { %v271_v43 = vpack.c.bf16 %v269_v41, %v269_v41  ;;  %v270_v37 = vpack.c.bf16 %v268_v42, %v268_v42 }
 0x170   :  { %679 = vmatpush3.bf16.msra.mxu0 %v727_v45 }
 0x171   :  { %437 = vmatprep.mubr.bf16.mxu1 %v271_v43  ;;  %680 = vmatprep.subr.bf16.mxu0 %v890_v44 }
 0x172   :  { %438 = vmatmul.mubr.bf16.vlgmr.msra.gmra.mrb[0].mxu1 %v270_v37 }
 0x174   :  { %681 = vmatpush3.bf16.msra.mxu0 %v728_v46 }
 0x175   :  { %682 = vmatprep.subr.bf16.mxu0 %v890_v44 }
 0x178   :  { %683 = vmatpush3.bf16.msra.mxu0 %v729_v47 }
 0x179   :  { %684 = vmatprep.subr.bf16.mxu0 %v890_v44 }
 0x17c   :  { %685 = vmatpush3.bf16.msra.mxu0 %v730_v48 }
 0x17d   :  { %686 = vmatprep.subr.bf16.mxu0 %v890_v44 }
 0x180   :  { %687 = vmatpush3.bf16.msra.mxu0 %v731_v49 }
 0x245   :  { %v657_v51 = vpop.f32.mrb[0].mxu1 }
 0x246   :  { %v658_v53 = vpop.f32.mrb[1].mxu1 }
 0x247   :  { %v659_v54 = vadd.f32 %v658_v53, %v657_v51  ;;  %v660_v55 = vpop.f32.mrb[2].mxu1 }
 0x248   :  { %v661_v56 = vpop.f32.mrb[3].mxu1 }
 0x249   :  { %v440_v57 = vadd.f32 %v659_v54, %v308_v52 }
 0x24b   :  { %v445_v58 = vmax.f32 %v440_v57, 0.0 }
 0x24d   :  { %v446_v59 = vmul.f32 %v445_v58, %v445_v58  ;;  %v447_v60 = vrot.slane %v445_v58, 4 }
 0x24f   :  { %v448_v61 = vadd.f32 %v447_v60, %v445_v58  ;;  %v453_v62 = vrot.slane %v446_v59, 4 }
 0x251   :  { %v449_v63 = vrot.slane %v448_v61, 2  ;;  %v454_v0 = vadd.f32 %v453_v62, %v446_v59 }
 0x253   :  { %v450_v1 = vadd.f32 %v449_v63, %v448_v61  ;;  %v455_v2 = vrot.slane %v454_v0, 2 }
 0x255   :  { %v451_v3 = vrot.slane %v450_v1, 1  ;;  %v456_v4 = vadd.f32 %v455_v2, %v454_v0 }
 0x257   :  { %v452_v5 = vadd.f32 %v451_v3, %v450_v1  ;;  %v457_v6 = vrot.slane %v456_v4, 1 }
 0x259   :  { %v458_v7 = vadd.f32 %v457_v6, %v456_v4  ;;  %v459_v23 = vmul.f32 0.125, %v452_v5 }
 0x25b   :  { %v460_v8 = vmul.f32 0.125, %v458_v7  ;;  %v461_v9 = vmul.f32 %v459_v23, %v459_v23 }
 0x25d   :  { %v462_v10 = vsub.f32 %v460_v8, %v461_v9 }
 0x25f   :  { %v463_v11 = vmax.f32 %v462_v10, 0.0 }
 0x261   :  { %v464_v12 = vadd.f32 1e-05, %v463_v11 }
 0x263   :  { %736 = vrsqrt.f32 %v464_v12 }
 0x26d   :  { %v737_v13 = vpop.eup %736 }
 0x26e   :  { %v466_v14 = vmul.f32 %v737_v13, %v304_v50 }
 0x270   :  { %v467_v15 = vmul.f32 %v466_v14, %v459_v23  ;;  %v475_v18 = vrot.slane %v466_v14, %v1013_v16 }
 0x272   :  { %v469_v17 = vrot.slane %v467_v15, 7  ;;  %v476_v20 = vmul.f32 %v475_v18, %v445_v58 }
 0x274   :  { %v471_v19 = vsub.f32 %v304_v50, %v469_v17 }
 0x276   :  { %v480_v21 = vrot.slane %v471_v19, %v1021_v32 }
 0x278   :  { %v481_v25 = vadd.f32 %v480_v21, %v476_v20 }
 0x27a   :  { %v482_v26 = vpack.c.bf16 %v481_v25, %v481_v25 }
 0x27c   :  { %689 = vmatmul.mubr.bf16.vlgmr.msra.gmra.mrb[4].mxu0 %v482_v26 }
 0x34f   :  { %v588_v28 = vpop.f32.mrb[4].mxu0 }
 0x350   :  { %v589_v29 = vadd.f32 %v632_v27, %v588_v28  ;;  %v690_v30 = vpop.f32.mrb[5].mxu0 }
 0x351   :  { %v591_v31 = vpop.f32.mrb[6].mxu0 }
 0x352   :  { %738 = vtanh.f32 %v589_v29  ;;  %v691_v33 = vpop.f32.mrb[7].mxu0 }
 0x35c   :  { %v739_v16 = vpop.eup %738 }
 0x35d   :  { %595 = vst [vmem:[#allocation11] sm:$0xff] %v739_v16 }
 0x35e   :  { %861 = shalt.err (!%p858_p2)
}
 0x35f   :  { %s862_s19 = scalar_lea.hbm %s1056_s7, 128 }
 0x360   :  { %p863_p3 = scmp.ne.s32.totalorder %s1056_s7, %s862_s19  ;;  %p866_p4 = scmp.lt.u32.totalorder %s862_s19, %s1056_s7 }
 0x362   :  { %p868_p5 = pnand %p866_p4, %p863_p3 }
 0x364   :  { %871 = shalt.err (!%p868_p5)
}
 0x365   :  { %605 = dma.vmem_to_hbm [thread:$0]  %s603_s16, 128, %s1056_s7, [#allocation4]  }
 0x366   :  { %878 = dma.done.wait [#allocation4], 128  }
 0x367   :  { %879 = vsyncadd [#allocation4], 4294967168 }
 0x368   :  { %609 = vsyncpa [#allocation3], 1 }
 0x369   :  { %610 = vsyncpa [#allocation6], 1 }
 0x36a   :  { %611 = vsyncpa [#allocation9], 1 }
 0x36b   :  { %612 = vsyncpa [#allocation4], 1 }

</bundles_post_ra>
